<compile_context>
chip_gen: v6e
topology: v6e:2x2x1
jax: 0.10.0
libtpu: 0.0.40
codegen_flags: <defaults>
</compile_context>

<pallas_src>
import functools

import jax
import jax.numpy as jnp
from jax.experimental import pallas as pl
from jax.experimental.pallas import tpu as pltpu


def _ctx_copy_kernel(ctx_hbm, emb_hbm, out_ref, sems, *,
                     n_ctx, cpb, n_sub, rem, n_splits):
    """Direct HBM->HBM scatter of the learned-context rows (same-dtype CSC).

    ctx_hbm : (n_cls, n_ctx, D) HBM  — learned context, never staged in VMEM.
    emb_hbm : (n_cls, seq,  D)  HBM  — token embedding, aliased to out_ref
                                       (present only so its buffer is donated).
    out_ref : (n_cls, seq,  D)  HBM  — prompts.  Prefix row 0 and suffix rows
                                       >= 1+n_ctx already hold the right values
                                       via aliasing; only rows [1, 1+n_ctx) are
                                       overwritten here.
    sems    : (n_sub + 1,) DMA semaphores.
    """
    del emb_hbm  # aliased to out_ref; nothing to read from it
    i = pl.program_id(0)
    c0 = i * cpb                    # start class of this grid step
    sub = cpb // n_sub              # static sub-chunk size

    # Start every DMA for this step before waiting on any of them.
    copies = []
    for j in range(n_sub):          # static, unrolled
        sz = sub + (cpb - n_sub * sub if j == n_sub - 1 else 0)
        cj = c0 + j * sub
        cp = pltpu.make_async_copy(
            ctx_hbm.at[pl.ds(cj, sz)],
            out_ref.at[pl.ds(cj, sz), pl.ds(1, n_ctx), :],
            sems.at[j],
        )
        cp.start()
        copies.append(cp)

    if rem > 0:                     # static: ragged class tail
        @pl.when(i == n_splits - 1)
        def _():
            r0 = n_splits * cpb
            cp_r = pltpu.make_async_copy(
                ctx_hbm.at[pl.ds(r0, rem)],
                out_ref.at[pl.ds(r0, rem), pl.ds(1, n_ctx), :],
                sems.at[n_sub],
            )
            cp_r.start()
            cp_r.wait()

    for cp in copies:
        cp.wait()


def _ctx_stage_kernel(ctx_ref, emb_hbm, out_ref, stage_ref, sem, *, n_ctx, c_blk):
    """VMEM-staged variant: cast (and broadcast for generic ctx) in-kernel.

    ctx_ref   : (c_blk or 1, n_ctx, D) VMEM — auto-pipelined context block
                (for generic ctx the single block stays resident across steps).
    stage_ref : (c_blk, n_ctx, D) VMEM scratch in the output dtype.
    """
    del emb_hbm  # aliased to out_ref; nothing to read from it
    c0 = pl.multiple_of(pl.program_id(0) * c_blk, c_blk)
    x = ctx_ref[...].astype(stage_ref.dtype)                # in-kernel VPU cast
    stage_ref[...] = jnp.broadcast_to(x, stage_ref.shape)   # no-op for CSC ctx
    cp = pltpu.make_async_copy(
        stage_ref,
        out_ref.at[pl.ds(c0, c_blk), pl.ds(1, n_ctx), :],
        sem.at[0],
    )
    cp.start()
    cp.wait()


def _pick_class_block(n_cls, target):
    """Largest divisor of n_cls that is <= target (>= 1), staged path only."""
    target = max(1, min(target, n_cls))
    for b in range(target, 0, -1):
        if n_cls % b == 0:
            return b
    return 1


def _forward_hbm_direct(ctx, embedding, *, n_ctx, n_splits, n_sub):
    """Same-dtype CSC path: a few big strided HBM->HBM DMAs, no VMEM staging."""
    n_cls, seq_len, d = embedding.shape
    n_splits = max(1, min(n_splits, n_cls))   # >= 2 keeps both v7x TCs busy
    cpb = n_cls // n_splits                   # classes per grid step (static)
    rem = n_cls - n_splits * cpb              # ragged tail handled on last step
    n_sub = max(1, min(n_sub, cpb))           # DMAs in flight per step

    kernel = functools.partial(_ctx_copy_kernel, n_ctx=n_ctx, cpb=cpb,
                               n_sub=n_sub, rem=rem, n_splits=n_splits)
    return pl.pallas_call(
        kernel,
        out_shape=jax.ShapeDtypeStruct((n_cls, seq_len, d), embedding.dtype),
        grid=(n_splits,),
        in_specs=[
            pl.BlockSpec(memory_space=pl.ANY),   # ctx stays in HBM
            pl.BlockSpec(memory_space=pl.ANY),   # embedding stays in HBM
        ],
        out_specs=pl.BlockSpec(memory_space=pl.ANY),
        scratch_shapes=[pltpu.SemaphoreType.DMA((n_sub + 1,))],
        # Output reuses the embedding buffer: prefix/suffix rows never move.
        input_output_aliases={1: 0},
        compiler_params=pltpu.CompilerParams(
            dimension_semantics=("parallel",),
        ),
    )(ctx, embedding)


def _forward_vmem_staged(ctx, embedding, *, n_ctx, vmem_budget_bytes, max_block=256):
    """Mixed-dtype and/or generic-ctx path: cast/broadcast in VMEM, then DMA."""
    n_cls, seq_len, d = embedding.shape
    csc = ctx.ndim == 3
    ctx3 = ctx if csc else ctx.reshape(1, n_ctx, d)   # metadata reshape only

    ctx_b = jnp.dtype(ctx.dtype).itemsize
    out_b = jnp.dtype(embedding.dtype).itemsize
    # Per-class VMEM: double-buffered ctx input block (CSC only) + stage buffer.
    per_class = n_ctx * d * ((2 * ctx_b if csc else 0) + out_b)
    target = max(1, min(max_block, vmem_budget_bytes // max(per_class, 1)))
    c_blk = _pick_class_block(n_cls, target)

    if csc:
        ctx_spec = pl.BlockSpec((c_blk, n_ctx, d), lambda i: (i, 0, 0))
    else:
        # Single resident block; ctx HBM reads are n_ctx*D total, no broadcast
        # materialisation in HBM.
        ctx_spec = pl.BlockSpec((1, n_ctx, d), lambda i: (0, 0, 0))

    kernel = functools.partial(_ctx_stage_kernel, n_ctx=n_ctx, c_blk=c_blk)
    return pl.pallas_call(
        kernel,
        out_shape=jax.ShapeDtypeStruct((n_cls, seq_len, d), embedding.dtype),
        grid=(n_cls // c_blk,),
        in_specs=[ctx_spec, pl.BlockSpec(memory_space=pl.ANY)],
        out_specs=pl.BlockSpec(memory_space=pl.ANY),
        scratch_shapes=[
            pltpu.VMEM((c_blk, n_ctx, d), embedding.dtype),
            pltpu.SemaphoreType.DMA((1,)),
        ],
        input_output_aliases={1: 0},
        compiler_params=pltpu.CompilerParams(
            dimension_semantics=("parallel",),
        ),
    )(ctx3, embedding)


def prompt_learner_forward(ctx, embedding, *, n_ctx, n_splits=2,
                           n_dma_per_step=2, vmem_budget_bytes=8 << 20):
    """Pallas implementation of PromptLearner.forward() for 'end' positioning.

    ctx       : (n_cls, n_ctx, D) learned context (CSC=True), or (n_ctx, D)
                generic context (shared by all classes, as in the module).
    embedding : (n_cls, seq_len, D) CLIP token embedding of the tokenized
                prompts "X X ... X <classname>." — token_prefix / token_suffix
                are its row-slices, so passing it whole is equivalent to the
                original 3-way concat.  Its buffer is aliased to the output;
                donate it at the jit boundary for a true zero-copy (without
                donation XLA inserts a copy — still correct, just slower).
    returns   : (n_cls, seq_len, D) prompts.
    """
    # TODO(synk): only class_token_position == 'end' is implemented; the
    # 'middle'/'front' per-class ragged layouts are left to the host.
    n_cls, seq_len, d = embedding.shape
    assert seq_len >= 1 + n_ctx, "prompt too short for the context tokens"
    if ctx.ndim == 2:
        assert ctx.shape == (n_ctx, d), ctx.shape
    else:
        assert ctx.shape == (n_cls, n_ctx, d), ctx.shape

    if ctx.ndim == 3 and ctx.dtype == embedding.dtype:
        return _forward_hbm_direct(ctx, embedding, n_ctx=n_ctx,
                                   n_splits=n_splits, n_sub=n_dma_per_step)
    return _forward_vmem_staged(ctx, embedding, n_ctx=n_ctx,
                                vmem_budget_bytes=vmem_budget_bytes)


if __name__ == "__main__":
    # Small deterministic setup mirroring __init__:
    #   ctx_vectors ~ N(0, 0.02), embedding = token_embedding(tokenized_prompts)
    # Real CLIP shapes are seq_len=77, D=512; small-but-lane-dense here.
    # TODO(synk): the real module runs CLIP's tokenizer + token_embedding; we
    # substitute deterministic random embeddings with the same shapes.
    n_ctx = 8
    ctx_dim = 128
    seq_len = 24

    key = jax.random.PRNGKey(0)
    k_ctx, k_emb, k_ctx2, k_emb2 = jax.random.split(key, 4)

    forward = jax.jit(
        functools.partial(prompt_learner_forward, n_ctx=n_ctx),
        donate_argnums=(1,),  # donate `embedding` so the alias is zero-copy
    )

    # --- Test 1: CSC context, same dtype -> direct HBM->HBM DMA path --------
    # n_cls=9 exercises the ragged-tail remainder DMA (9 = 2 steps * 4 + 1).
    n_cls = 9
    ctx = (0.02 * jax.random.normal(k_ctx, (n_cls, n_ctx, ctx_dim))).astype(jnp.float32)
    embedding = jax.random.normal(k_emb, (n_cls, seq_len, ctx_dim)).astype(jnp.float32)

    # Reference computed BEFORE the kernel call (embedding buffer is donated).
    ref = jnp.concatenate(
        [embedding[:, :1, :], ctx, embedding[:, 1 + n_ctx:, :]], axis=1)
    ref = jax.block_until_ready(ref)

    prompts = jax.block_until_ready(forward(ctx, embedding))
    assert prompts.shape == (n_cls, seq_len, ctx_dim), prompts.shape
    assert prompts.dtype == ref.dtype
    assert jnp.array_equal(prompts, ref), "CSC / same-dtype path mismatch"

    # --- Test 2: generic context, mixed dtype -> VMEM-staged path -----------
    n_cls2 = 10
    ctx_g = (0.02 * jax.random.normal(k_ctx2, (n_ctx, ctx_dim))).astype(jnp.float32)
    embedding2 = jax.random.normal(
        k_emb2, (n_cls2, seq_len, ctx_dim)).astype(jnp.bfloat16)

    ctx_bcast = jnp.broadcast_to(
        ctx_g.astype(jnp.bfloat16)[None], (n_cls2, n_ctx, ctx_dim))
    ref2 = jnp.concatenate(
        [embedding2[:, :1, :], ctx_bcast, embedding2[:, 1 + n_ctx:, :]], axis=1)
    ref2 = jax.block_until_ready(ref2)

    prompts2 = jax.block_until_ready(forward(ctx_g, embedding2))
    assert prompts2.shape == (n_cls2, seq_len, ctx_dim), prompts2.shape
    assert prompts2.dtype == ref2.dtype
    assert jnp.array_equal(prompts2, ref2), "generic / mixed-dtype path mismatch"

    print("KERNEL_OK")
</pallas_src>

<mosaic_0001>
module attributes {stable_mosaic.version = 11 : i64} {
  func.func @_ctx_copy_kernel(%arg0: i32, %arg1: memref<9x8x128xf32, #tpu.memory_space<any>>, %arg2: memref<9x24x128xf32, #tpu.memory_space<any>>, %arg3: memref<9x24x128xf32, #tpu.memory_space<any>>, %arg4: memref<3x!tpu.dma_semaphore, #tpu.memory_space<semaphore_mem>>) attributes {dimension_semantics = [#tpu.dimension_semantics<parallel>], iteration_bounds = array<i64: 2>, scalar_prefetch = 0 : i64, scratch_operands = 1 : i64, tpu.core_type = #tpu.core_type<tc>, window_params = [{}, {}, {}]} {
    %c4_i32 = arith.constant 4 : i32
    %0 = arith.muli %arg0, %c4_i32 : i32
    %c0_i32 = arith.constant 0 : i32
    %1 = arith.addi %0, %c0_i32 : i32
    %c0_i32_0 = arith.constant 0 : i32
    %c0_i32_1 = arith.constant 0 : i32
    %c0_i32_2 = arith.constant 0 : i32
    %2 = tpu.memref_slice %arg1[%1, %c0_i32_1, %c0_i32_2] : memref<9x8x128xf32, #tpu.memory_space<any>> -> memref<2x8x128xf32, #tpu.memory_space<any>>
    %c1_i32 = arith.constant 1 : i32
    %c0_i32_3 = arith.constant 0 : i32
    %3 = tpu.memref_slice %arg3[%1, %c1_i32, %c0_i32_3] : memref<9x24x128xf32, #tpu.memory_space<any>> -> memref<2x8x128xf32, #tpu.memory_space<any>>
    %4 = tpu.memref_slice %arg4[%c0_i32_0] : memref<3x!tpu.dma_semaphore, #tpu.memory_space<semaphore_mem>> -> memref<1x!tpu.dma_semaphore, #tpu.memory_space<semaphore_mem>>
    %5 = tpu.memref_squeeze %4 : memref<1x!tpu.dma_semaphore, #tpu.memory_space<semaphore_mem>> -> memref<!tpu.dma_semaphore, #tpu.memory_space<semaphore_mem>>
    tpu.enqueue_dma source(%2 : memref<2x8x128xf32, #tpu.memory_space<any>>) target(%3 : memref<2x8x128xf32, #tpu.memory_space<any>>) target_semaphore(%5 : memref<!tpu.dma_semaphore, #tpu.memory_space<semaphore_mem>>)
    %c2_i32 = arith.constant 2 : i32
    %6 = arith.addi %0, %c2_i32 : i32
    %c1_i32_4 = arith.constant 1 : i32
    %c0_i32_5 = arith.constant 0 : i32
    %c0_i32_6 = arith.constant 0 : i32
    %7 = tpu.memref_slice %arg1[%6, %c0_i32_5, %c0_i32_6] : memref<9x8x128xf32, #tpu.memory_space<any>> -> memref<2x8x128xf32, #tpu.memory_space<any>>
    %c1_i32_7 = arith.constant 1 : i32
    %c0_i32_8 = arith.constant 0 : i32
    %8 = tpu.memref_slice %arg3[%6, %c1_i32_7, %c0_i32_8] : memref<9x24x128xf32, #tpu.memory_space<any>> -> memref<2x8x128xf32, #tpu.memory_space<any>>
    %9 = tpu.memref_slice %arg4[%c1_i32_4] : memref<3x!tpu.dma_semaphore, #tpu.memory_space<semaphore_mem>> -> memref<1x!tpu.dma_semaphore, #tpu.memory_space<semaphore_mem>>
    %10 = tpu.memref_squeeze %9 : memref<1x!tpu.dma_semaphore, #tpu.memory_space<semaphore_mem>> -> memref<!tpu.dma_semaphore, #tpu.memory_space<semaphore_mem>>
    tpu.enqueue_dma source(%7 : memref<2x8x128xf32, #tpu.memory_space<any>>) target(%8 : memref<2x8x128xf32, #tpu.memory_space<any>>) target_semaphore(%10 : memref<!tpu.dma_semaphore, #tpu.memory_space<semaphore_mem>>)
    %c1_i32_9 = arith.constant 1 : i32
    %11 = arith.cmpi eq, %arg0, %c1_i32_9 : i32
    %12 = arith.extui %11 : i1 to i32
    %c0_i32_10 = arith.constant 0 : i32
    %13 = arith.cmpi ne, %12, %c0_i32_10 : i32
    scf.if %13 {
      %c2_i32_21 = arith.constant 2 : i32
      %c8_i32 = arith.constant 8 : i32
      %c0_i32_22 = arith.constant 0 : i32
      %c0_i32_23 = arith.constant 0 : i32
      %22 = tpu.memref_slice %arg1[%c8_i32, %c0_i32_22, %c0_i32_23] : memref<9x8x128xf32, #tpu.memory_space<any>> -> memref<1x8x128xf32, #tpu.memory_space<any>>
      %c8_i32_24 = arith.constant 8 : i32
      %c1_i32_25 = arith.constant 1 : i32
      %c0_i32_26 = arith.constant 0 : i32
      %23 = tpu.memref_slice %arg3[%c8_i32_24, %c1_i32_25, %c0_i32_26] : memref<9x24x128xf32, #tpu.memory_space<any>> -> memref<1x8x128xf32, #tpu.memory_space<any>>
      %24 = tpu.memref_slice %arg4[%c2_i32_21] : memref<3x!tpu.dma_semaphore, #tpu.memory_space<semaphore_mem>> -> memref<1x!tpu.dma_semaphore, #tpu.memory_space<semaphore_mem>>
      %25 = tpu.memref_squeeze %24 : memref<1x!tpu.dma_semaphore, #tpu.memory_space<semaphore_mem>> -> memref<!tpu.dma_semaphore, #tpu.memory_space<semaphore_mem>>
      tpu.enqueue_dma source(%22 : memref<1x8x128xf32, #tpu.memory_space<any>>) target(%23 : memref<1x8x128xf32, #tpu.memory_space<any>>) target_semaphore(%25 : memref<!tpu.dma_semaphore, #tpu.memory_space<semaphore_mem>>)
      %c2_i32_27 = arith.constant 2 : i32
      %c8_i32_28 = arith.constant 8 : i32
      %c0_i32_29 = arith.constant 0 : i32
      %c0_i32_30 = arith.constant 0 : i32
      %26 = tpu.memref_slice %arg1[%c8_i32_28, %c0_i32_29, %c0_i32_30] : memref<9x8x128xf32, #tpu.memory_space<any>> -> memref<1x8x128xf32, #tpu.memory_space<any>>
      %c8_i32_31 = arith.constant 8 : i32
      %c1_i32_32 = arith.constant 1 : i32
      %c0_i32_33 = arith.constant 0 : i32
      %27 = tpu.memref_slice %arg3[%c8_i32_31, %c1_i32_32, %c0_i32_33] : memref<9x24x128xf32, #tpu.memory_space<any>> -> memref<1x8x128xf32, #tpu.memory_space<any>>
      %28 = tpu.memref_slice %arg4[%c2_i32_27] : memref<3x!tpu.dma_semaphore, #tpu.memory_space<semaphore_mem>> -> memref<1x!tpu.dma_semaphore, #tpu.memory_space<semaphore_mem>>
      %29 = tpu.memref_squeeze %28 : memref<1x!tpu.dma_semaphore, #tpu.memory_space<semaphore_mem>> -> memref<!tpu.dma_semaphore, #tpu.memory_space<semaphore_mem>>
      tpu.wait_dma2 semaphore(%29 : memref<!tpu.dma_semaphore, #tpu.memory_space<semaphore_mem>>) src(%26 : memref<1x8x128xf32, #tpu.memory_space<any>>) dst(%27 : memref<1x8x128xf32, #tpu.memory_space<any>>)
    } else {
    }
    %c0_i32_11 = arith.constant 0 : i32
    %c0_i32_12 = arith.constant 0 : i32
    %c0_i32_13 = arith.constant 0 : i32
    %14 = tpu.memref_slice %arg1[%1, %c0_i32_12, %c0_i32_13] : memref<9x8x128xf32, #tpu.memory_space<any>> -> memref<2x8x128xf32, #tpu.memory_space<any>>
    %c1_i32_14 = arith.constant 1 : i32
    %c0_i32_15 = arith.constant 0 : i32
    %15 = tpu.memref_slice %arg3[%1, %c1_i32_14, %c0_i32_15] : memref<9x24x128xf32, #tpu.memory_space<any>> -> memref<2x8x128xf32, #tpu.memory_space<any>>
    %16 = tpu.memref_slice %arg4[%c0_i32_11] : memref<3x!tpu.dma_semaphore, #tpu.memory_space<semaphore_mem>> -> memref<1x!tpu.dma_semaphore, #tpu.memory_space<semaphore_mem>>
    %17 = tpu.memref_squeeze %16 : memref<1x!tpu.dma_semaphore, #tpu.memory_space<semaphore_mem>> -> memref<!tpu.dma_semaphore, #tpu.memory_space<semaphore_mem>>
    tpu.wait_dma2 semaphore(%17 : memref<!tpu.dma_semaphore, #tpu.memory_space<semaphore_mem>>) src(%14 : memref<2x8x128xf32, #tpu.memory_space<any>>) dst(%15 : memref<2x8x128xf32, #tpu.memory_space<any>>)
    %c1_i32_16 = arith.constant 1 : i32
    %c0_i32_17 = arith.constant 0 : i32
    %c0_i32_18 = arith.constant 0 : i32
    %18 = tpu.memref_slice %arg1[%6, %c0_i32_17, %c0_i32_18] : memref<9x8x128xf32, #tpu.memory_space<any>> -> memref<2x8x128xf32, #tpu.memory_space<any>>
    %c1_i32_19 = arith.constant 1 : i32
    %c0_i32_20 = arith.constant 0 : i32
    %19 = tpu.memref_slice %arg3[%6, %c1_i32_19, %c0_i32_20] : memref<9x24x128xf32, #tpu.memory_space<any>> -> memref<2x8x128xf32, #tpu.memory_space<any>>
    %20 = tpu.memref_slice %arg4[%c1_i32_16] : memref<3x!tpu.dma_semaphore, #tpu.memory_space<semaphore_mem>> -> memref<1x!tpu.dma_semaphore, #tpu.memory_space<semaphore_mem>>
    %21 = tpu.memref_squeeze %20 : memref<1x!tpu.dma_semaphore, #tpu.memory_space<semaphore_mem>> -> memref<!tpu.dma_semaphore, #tpu.memory_space<semaphore_mem>>
    tpu.wait_dma2 semaphore(%21 : memref<!tpu.dma_semaphore, #tpu.memory_space<semaphore_mem>>) src(%18 : memref<2x8x128xf32, #tpu.memory_space<any>>) dst(%19 : memref<2x8x128xf32, #tpu.memory_space<any>>)
    return
  }
}

</mosaic_0001>

<bundles_post_ra>
// kernel: prompt_learner_forward.1
= control target key start
LH: loop header
LB: loop body
LE: loop exit
PB: predicated region body
PF: predicated region fallthrough
CT: control target
= control target key end

     0   :  { %s196_s9 = smov 0   ;;  %s219_s0 = inlined_call_operand.hbm [shape: f32[9,8,128], index: 0, kind: input, shape index: {}]   ;;  %s220_s1 = inlined_call_operand.hbm [shape: f32[9,24,128], index: 1, kind: input, shape index: {}, may-alias: {1,2}]   ;;  %s221_s2 = inlined_call_operand.hbm [shape: f32[9,24,128], index: 2, kind: output, shape index: {}, may-alias: {1,2}]  }
   0x1 LB: > { %s135_s10 = sshll.u32 %s171_s9, 9  ;;  %s124_s11 = smul.u32 1536, %s171_s9  ;;  %s171_s9 = sphi %s196_s9, %s12_s9  }
   0x2   : > { %s17_s14 = scalar_lea.hbm %s219_s0, %s135_s10  ;;  %s173_s17 = smov 128  }
   0x3   : > { %s105_s16 = scalar_lea.hbm %s221_s2, %s124_s11  ;;  %28 = sst [smem:[#allocation4]] %s173_s17 }
   0x4   : > { %s106_s18 = scalar_lea.hbm %s105_s16, 16  ;;  %s174_s19 = smov 384  }
   0x5   : > { %30 = sst [smem:[#allocation4 + $0x1]] %s174_s19  ;;  %s175_s20 = smov 8  }
   0x6   : > { %32 = sst [smem:[#allocation4 + $0x2]] %s175_s20  ;;  %s176_s21 = smov [#allocation2]  }
   0x7   : > { %s177_s22 = smov 131072   ;;  %s178_s23 = smov 0  }
   0x8   : > { %34 = dma.general %s17_s14, 256, %s106_s18, %s176_s21, %s177_s22, [#allocation4], %s178_s23, 0  }
   0x9   : > { %s110_s24 = scalar_lea.hbm %s17_s14, 256  ;;  %s115_s25 = scalar_lea.hbm %s105_s16, 784 }
   0xa   : > { %50 = sst [smem:[#allocation6]] %s173_s17  ;;  %p140_p0 = scmp.eq.s32.totalorder %s171_s9, 1 }
   0xb   : > { %52 = sst [smem:[#allocation6 + $0x1]] %s174_s19  ;;  %s179_s26 = smov [#allocation2 + $0x1]  }
   0xc   : > { %54 = sst [smem:[#allocation6 + $0x2]] %s175_s20  ;;  %s61_s29 = scalar_lea.hbm %s219_s0, 1024 }
   0xd   : > { %56 = dma.general %s110_s24, 256, %s115_s25, %s179_s26, %s177_s22, [#allocation6], %s178_s23, 0  }
   0xe   : > { %s62_s4 = scalar_lea.hbm %s221_s2, 3088  ;;  %s180_s5 = smov [#allocation2 + $0x2]  }
   0xf   : > { %138 = dma.general (%p140_p0), %s61_s29, 128, %s62_s4, %s180_s5, %s177_s22, [#allocation8], %s178_s23, 0  }
  0x10   : > { %162 = dma.done.wait (%p140_p0), [#allocation2 + $0x2], 128 }
  0x11   : > { %164 = vsyncadd (%p140_p0), [#allocation2 + $0x2], 4294967168 }
  0x12   : > { %165 = dma.done.wait [#allocation2], 256 }
  0x13   : > { %166 = vsyncadd [#allocation2], 4294967040 }
  0x14   : > { %167 = dma.done.wait [#allocation2 + $0x1], 256 }
  0x15   : > { %168 = vsyncadd [#allocation2 + $0x1], 4294967040  ;;  %s12_s9 = sadd.s32 1, %s171_s9  }
  0x16   : > { %p9_p1 = scmp.ge.s32.totalorder %s12_s9, 2  }
  0x18   :  { %11 = sbr.rel (!%p9_p1) target bundleno = 1 (0x1), region = 37 }
  0x1d   :  { %81 = vsyncmov [#allocation2] }
  0x20   :  { %s82_s6 = vpop.sfrf %81 }
  0x21   :  { %p131_p2 = scmp.ne.s32.totalorder %s82_s6, 0 }
  0x23   :  { %86 = shalt.err (%p131_p2)  }
  0x24   :  { %88 = vsyncmov [#allocation2 + $0x1] }
  0x27   :  { %s89_s7 = vpop.sfrf %88 }
  0x28   :  { %p132_p3 = scmp.ne.s32.totalorder %s89_s7, 0 }
  0x2a   :  { %93 = shalt.err (%p132_p3)  }
  0x2b   :  { %95 = vsyncmov [#allocation2 + $0x2] }
  0x2e   :  { %s96_s8 = vpop.sfrf %95 }
  0x2f   :  { %p133_p4 = scmp.ne.s32.totalorder %s96_s8, 0 }
  0x31   :  { %100 = shalt.err (%p133_p4)  }

</bundles_post_ra>
